<compile_context>
chip_gen: v7x
topology: tpu7x:2x2x1
jax: 0.10.0
libtpu: 0.0.40
codegen_flags: <defaults>
</compile_context>

<pallas_src>
import jax
import jax.numpy as jnp
from jax import lax
from jax.experimental import pallas as pl
from jax.experimental.pallas import tpu as pltpu

BN_EPS = 1e-5        # nn.BatchNorm1d default eps
NORM_EPS = 1e-12     # F.normalize default eps

_VMEM_LIMIT = 48 * 1024 * 1024             # < v7x 64 MiB/TC, > v5e/v6e defaults
_CONTRACT_LAST = (((1,), (1,)), ((), ()))  # x @ W^T for torch-layout weights


def _stats_kernel(x_ref, w1_ref, h_ref, sum_ref, ssq_ref, acc_ref):
    """Pass 0: h = x @ W1^T (tiled over batch i, contraction k) plus
    per-feature batch sum / sum-of-squares for the BatchNorm statistics."""
    i = pl.program_id(0)
    k = pl.program_id(1)
    nk = pl.num_programs(1)

    @pl.when(k == 0)
    def _():
        acc_ref[...] = jnp.zeros_like(acc_ref)

    @pl.when((i == 0) & (k == 0))
    def _():
        sum_ref[...] = jnp.zeros_like(sum_ref)
        ssq_ref[...] = jnp.zeros_like(ssq_ref)

    acc_ref[...] += lax.dot_general(
        x_ref[...], w1_ref[...], _CONTRACT_LAST,
        preferred_element_type=jnp.float32)

    @pl.when(k == nk - 1)
    def _():
        h = acc_ref[...]
        h_ref[...] = h.astype(h_ref.dtype)
        sum_ref[...] += jnp.sum(h, axis=0, keepdims=True)
        ssq_ref[...] += jnp.sum(h * h, axis=0, keepdims=True)


def _apply_kernel(h_ref, scale_ref, shift_ref, w2_ref, o_ref):
    """Pass 1: fused BN(scale/shift) + ReLU + Linear2 + row L2-normalize."""
    h = h_ref[...].astype(jnp.float32)
    a = jnp.maximum(h * scale_ref[...] + shift_ref[...], jnp.float32(0.0))
    z = lax.dot_general(
        a.astype(w2_ref.dtype), w2_ref[...], _CONTRACT_LAST,
        preferred_element_type=jnp.float32)
    # F.normalize: z / max(||z||, eps) == z * rsqrt(max(||z||^2, eps^2))
    sq = jnp.sum(z * z, axis=1, keepdims=True)
    inv = lax.rsqrt(jnp.maximum(sq, jnp.float32(NORM_EPS * NORM_EPS)))
    o_ref[...] = (z * inv).astype(o_ref.dtype)


def _choose_tile(dim, preferred, multiple):
    """Largest divisor of `dim` that is <= preferred and a multiple of
    `multiple`; falls back to the full dim (always a valid block)."""
    if dim <= preferred:
        return dim
    t = (preferred // multiple) * multiple
    while t >= multiple:
        if dim % t == 0:
            return t
        t -= multiple
    return dim


def projection_forward(x, params, *, matmul_dtype=jnp.bfloat16,
                       tile_m=256, tile_k=512):
    """Forward pass of Projection (depth=1).

    x: (N, input_dim) float32.
    params: torch-shaped weights: w1 (hidden, input), b1 (hidden,), gamma/beta
    (hidden,), w2 (output, hidden).  b1 is intentionally unused — train-mode
    BatchNorm removes the per-feature bias exactly.
    """
    n, d_in = x.shape
    w1 = params["w1"]
    gamma = params["gamma"]
    beta = params["beta"]
    w2 = params["w2"]
    hidden = w1.shape[0]
    d_out = w2.shape[0]

    tm = _choose_tile(n, tile_m, 8)
    tk = _choose_tile(d_in, tile_k, 128)
    nm = n // tm
    nk = d_in // tk

    x_mm = x.astype(matmul_dtype)
    w1_mm = jnp.asarray(w1, matmul_dtype)     # torch layout (hidden, d_in)
    w2_mm = jnp.asarray(w2, matmul_dtype)     # torch layout (d_out, hidden)

    # ---- Pass 0: Linear1 + batch statistics --------------------------------
    h, h_sum, h_ssq = pl.pallas_call(
        _stats_kernel,
        grid=(nm, nk),
        in_specs=(
            pl.BlockSpec((tm, tk), lambda i, k: (i, k)),        # x tile
            pl.BlockSpec((hidden, tk), lambda i, k: (0, k)),    # W1 K-slab
        ),
        out_specs=(
            pl.BlockSpec((tm, hidden), lambda i, k: (i, 0)),    # h tile
            pl.BlockSpec((1, hidden), lambda i, k: (0, 0)),     # sum (resident)
            pl.BlockSpec((1, hidden), lambda i, k: (0, 0)),     # sumsq (resident)
        ),
        out_shape=(
            jax.ShapeDtypeStruct((n, hidden), matmul_dtype),
            jax.ShapeDtypeStruct((1, hidden), jnp.float32),
            jax.ShapeDtypeStruct((1, hidden), jnp.float32),
        ),
        scratch_shapes=[pltpu.VMEM((tm, hidden), jnp.float32)],
        compiler_params=pltpu.CompilerParams(
            dimension_semantics=("arbitrary", "arbitrary"),
            vmem_limit_bytes=_VMEM_LIMIT),
    )(x_mm, w1_mm)

    # ---- Tiny per-feature math: fold BN into a single scale/shift ----------
    mean = h_sum / jnp.float32(n)
    var = jnp.maximum(h_ssq / jnp.float32(n) - mean * mean, 0.0)  # biased var
    scale = jnp.asarray(gamma, jnp.float32)[None, :] * lax.rsqrt(var + BN_EPS)
    shift = jnp.asarray(beta, jnp.float32)[None, :] - mean * scale

    # ---- Pass 1: BN + ReLU + Linear2 + L2 normalize (batch-parallel) -------
    out = pl.pallas_call(
        _apply_kernel,
        grid=(nm,),
        in_specs=(
            pl.BlockSpec((tm, hidden), lambda i: (i, 0)),
            pl.BlockSpec((1, hidden), lambda i: (0, 0)),
            pl.BlockSpec((1, hidden), lambda i: (0, 0)),
            pl.BlockSpec((d_out, hidden), lambda i: (0, 0)),
        ),
        out_specs=pl.BlockSpec((tm, d_out), lambda i: (i, 0)),
        out_shape=jax.ShapeDtypeStruct((n, d_out), jnp.float32),
        compiler_params=pltpu.CompilerParams(
            dimension_semantics=("parallel",),
            vmem_limit_bytes=_VMEM_LIMIT),
    )(h, scale, shift, w2_mm)

    return out


def init_params(key, input_dim, hidden_dim, output_dim):
    """Deterministic synthetic parameters with torch-style shapes."""
    k1, k2, k3 = jax.random.split(key, 3)
    bound1 = 1.0 / (input_dim ** 0.5)
    bound2 = 1.0 / (hidden_dim ** 0.5)
    return {
        "w1": jax.random.uniform(k1, (hidden_dim, input_dim), jnp.float32,
                                 -bound1, bound1),
        "b1": jax.random.uniform(k2, (hidden_dim,), jnp.float32,
                                 -bound1, bound1),
        "gamma": jnp.ones((hidden_dim,), jnp.float32),
        "beta": jnp.zeros((hidden_dim,), jnp.float32),
        "w2": jax.random.uniform(k3, (output_dim, hidden_dim), jnp.float32,
                                 -bound2, bound2),
    }


def reference_forward(x, params):
    """Pure-JAX reference matching the PyTorch forward (train-mode BN)."""
    h = x @ params["w1"].T + params["b1"]
    mean = h.mean(axis=0, keepdims=True)
    var = ((h - mean) ** 2).mean(axis=0, keepdims=True)
    h = (h - mean) / jnp.sqrt(var + BN_EPS)
    h = h * params["gamma"] + params["beta"]
    h = jnp.maximum(h, 0.0)
    z = h @ params["w2"].T
    norm = jnp.maximum(jnp.linalg.norm(z, axis=1, keepdims=True), NORM_EPS)
    return z / norm


if __name__ == "__main__":
    # Small shapes consistent with the module (depth=1 projection head).
    N, INPUT_DIM, HIDDEN_DIM, OUTPUT_DIM = 8, 32, 64, 128

    key = jax.random.PRNGKey(0)
    kx, kp = jax.random.split(key)
    x = jax.random.normal(kx, (N, INPUT_DIM), jnp.float32)
    params = init_params(kp, INPUT_DIM, HIDDEN_DIM, OUTPUT_DIM)

    ref = reference_forward(x, params)

    # f32-matmul path: tight tolerance vs. the PyTorch-equivalent reference.
    out_f32 = jax.block_until_ready(
        projection_forward(x, params, matmul_dtype=jnp.float32))
    assert out_f32.shape == (N, OUTPUT_DIM)
    assert jnp.allclose(out_f32, ref, atol=2e-5, rtol=1e-4), "f32 mismatch"

    # bf16-matmul path (MXU-native operands, f32 accumulation + f32 BN/normalize).
    out_bf16 = jax.block_until_ready(
        projection_forward(x, params, matmul_dtype=jnp.bfloat16))
    assert out_bf16.shape == (N, OUTPUT_DIM)
    assert jnp.allclose(out_bf16, ref, atol=1e-2, rtol=1e-2), "bf16 mismatch"

    print("KERNEL_OK")
</pallas_src>

<mosaic_0001>
module attributes {stable_mosaic.version = 11 : i64} {
  func.func @_stats_kernel(%arg0: i32, %arg1: i32, %arg2: memref<8x32xf32, #tpu.memory_space<vmem>>, %arg3: memref<64x32xf32, #tpu.memory_space<vmem>>, %arg4: memref<8x64xf32, #tpu.memory_space<vmem>>, %arg5: memref<1x64xf32, #tpu.memory_space<vmem>>, %arg6: memref<1x64xf32, #tpu.memory_space<vmem>>, %arg7: memref<8x64xf32, #tpu.memory_space<vmem>>) attributes {dimension_semantics = [#tpu.dimension_semantics<arbitrary>, #tpu.dimension_semantics<arbitrary>], iteration_bounds = array<i64: 1, 1>, scalar_prefetch = 0 : i64, scratch_operands = 1 : i64, tpu.core_type = #tpu.core_type<tc>, window_params = [{transform_indices = @transform_0, window_bounds = array<i64: 8, 32>}, {transform_indices = @transform_1, window_bounds = array<i64: 64, 32>}, {transform_indices = @transform_2, window_bounds = array<i64: 8, 64>}, {pipeline_mode = #tpu.pipeline_mode<synchronous>, transform_indices = @transform_3, window_bounds = array<i64: 1, 64>}, {pipeline_mode = #tpu.pipeline_mode<synchronous>, transform_indices = @transform_4, window_bounds = array<i64: 1, 64>}]} {
    %c0_i32 = arith.constant 0 : i32
    %0 = arith.cmpi eq, %arg1, %c0_i32 : i32
    %1 = arith.extui %0 : i1 to i32
    %c0_i32_0 = arith.constant 0 : i32
    %2 = arith.cmpi ne, %1, %c0_i32_0 : i32
    scf.if %2 {
      %cst_13 = arith.constant 0.000000e+00 : f32
      %17 = vector.broadcast %cst_13 : f32 to vector<8x64xf32>
      %c0_14 = arith.constant 0 : index
      %c0_15 = arith.constant 0 : index
      %18 = vector.load %arg7[%c0_14, %c0_15] : memref<8x64xf32, #tpu.memory_space<vmem>>, vector<8x64xf32>
      tpu.vector_store %arg7[%c0_14, %c0_15], %17 {strides = array<i32>} : memref<8x64xf32, #tpu.memory_space<vmem>>, vector<8x64xf32>,
    } else {
    }
    %c0_i32_1 = arith.constant 0 : i32
    %3 = arith.cmpi eq, %arg0, %c0_i32_1 : i32
    %c0_i32_2 = arith.constant 0 : i32
    %4 = arith.cmpi eq, %arg1, %c0_i32_2 : i32
    %5 = arith.andi %3, %4 : i1
    %6 = arith.extui %5 : i1 to i32
    %c0_i32_3 = arith.constant 0 : i32
    %7 = arith.cmpi ne, %6, %c0_i32_3 : i32
    scf.if %7 {
      %cst_13 = arith.constant 0.000000e+00 : f32
      %17 = vector.broadcast %cst_13 : f32 to vector<1x64xf32>
      %c0_14 = arith.constant 0 : index
      %c0_15 = arith.constant 0 : index
      %18 = vector.load %arg5[%c0_14, %c0_15] : memref<1x64xf32, #tpu.memory_space<vmem>>, vector<1x64xf32>
      tpu.vector_store %arg5[%c0_14, %c0_15], %17 {strides = array<i32>} : memref<1x64xf32, #tpu.memory_space<vmem>>, vector<1x64xf32>,
      %cst_16 = arith.constant 0.000000e+00 : f32
      %19 = vector.broadcast %cst_16 : f32 to vector<1x64xf32>
      %c0_17 = arith.constant 0 : index
      %c0_18 = arith.constant 0 : index
      %20 = vector.load %arg6[%c0_17, %c0_18] : memref<1x64xf32, #tpu.memory_space<vmem>>, vector<1x64xf32>
      tpu.vector_store %arg6[%c0_17, %c0_18], %19 {strides = array<i32>} : memref<1x64xf32, #tpu.memory_space<vmem>>, vector<1x64xf32>,
    } else {
    }
    %c0 = arith.constant 0 : index
    %c0_4 = arith.constant 0 : index
    %8 = vector.load %arg7[%c0, %c0_4] : memref<8x64xf32, #tpu.memory_space<vmem>>, vector<8x64xf32>
    %c0_5 = arith.constant 0 : index
    %c0_6 = arith.constant 0 : index
    %9 = vector.load %arg2[%c0_5, %c0_6] : memref<8x32xf32, #tpu.memory_space<vmem>>, vector<8x32xf32>
    %c0_7 = arith.constant 0 : index
    %c0_8 = arith.constant 0 : index
    %10 = vector.load %arg3[%c0_7, %c0_8] : memref<64x32xf32, #tpu.memory_space<vmem>>, vector<64x32xf32>
    %cst = arith.constant dense<0.000000e+00> : vector<8x64xf32>
    %11 = tpu.matmul %9, %10, %cst {dimension_numbers = #tpu.dot_dimension_numbers<[1], [1], [0], [0], [0, 0, 1, 0], [], []>} : vector<8x32xf32>, vector<64x32xf32>, vector<8x64xf32> -> vector<8x64xf32>
    %12 = arith.addf %8, %11 : vector<8x64xf32>
    %c0_9 = arith.constant 0 : index
    %c0_10 = arith.constant 0 : index
    %13 = vector.load %arg7[%c0_9, %c0_10] : memref<8x64xf32, #tpu.memory_space<vmem>>, vector<8x64xf32>
    tpu.vector_store %arg7[%c0_9, %c0_10], %12 {strides = array<i32>} : memref<8x64xf32, #tpu.memory_space<vmem>>, vector<8x64xf32>,
    %c0_i32_11 = arith.constant 0 : i32
    %14 = arith.cmpi eq, %arg1, %c0_i32_11 : i32
    %15 = arith.extui %14 : i1 to i32
    %c0_i32_12 = arith.constant 0 : i32
    %16 = arith.cmpi ne, %15, %c0_i32_12 : i32
    scf.if %16 {
      %c0_13 = arith.constant 0 : index
      %c0_14 = arith.constant 0 : index
      %17 = vector.load %arg7[%c0_13, %c0_14] : memref<8x64xf32, #tpu.memory_space<vmem>>, vector<8x64xf32>
      %c0_15 = arith.constant 0 : index
      %c0_16 = arith.constant 0 : index
      %18 = vector.load %arg4[%c0_15, %c0_16] : memref<8x64xf32, #tpu.memory_space<vmem>>, vector<8x64xf32>
      tpu.vector_store %arg4[%c0_15, %c0_16], %17 {strides = array<i32>} : memref<8x64xf32, #tpu.memory_space<vmem>>, vector<8x64xf32>,
      %c0_17 = arith.constant 0 : index
      %c0_18 = arith.constant 0 : index
      %19 = vector.load %arg5[%c0_17, %c0_18] : memref<1x64xf32, #tpu.memory_space<vmem>>, vector<1x64xf32>
      %cst_19 = arith.constant dense<0.000000e+00> : vector<64xf32>
      %20 = vector.multi_reduction <add>, %17, %cst_19 [0] : vector<8x64xf32> to vector<64xf32>
      %21 = vector.shape_cast %20 : vector<64xf32> to vector<1x64xf32>
      %22 = arith.addf %19, %21 : vector<1x64xf32>
      %c0_20 = arith.constant 0 : index
      %c0_21 = arith.constant 0 : index
      %23 = vector.load %arg5[%c0_20, %c0_21] : memref<1x64xf32, #tpu.memory_space<vmem>>, vector<1x64xf32>
      tpu.vector_store %arg5[%c0_20, %c0_21], %22 {strides = array<i32>} : memref<1x64xf32, #tpu.memory_space<vmem>>, vector<1x64xf32>,
      %c0_22 = arith.constant 0 : index
      %c0_23 = arith.constant 0 : index
      %24 = vector.load %arg6[%c0_22, %c0_23] : memref<1x64xf32, #tpu.memory_space<vmem>>, vector<1x64xf32>
      %25 = arith.mulf %17, %17 : vector<8x64xf32>
      %cst_24 = arith.constant dense<0.000000e+00> : vector<64xf32>
      %26 = vector.multi_reduction <add>, %25, %cst_24 [0] : vector<8x64xf32> to vector<64xf32>
      %27 = vector.shape_cast %26 : vector<64xf32> to vector<1x64xf32>
      %28 = arith.addf %24, %27 : vector<1x64xf32>
      %c0_25 = arith.constant 0 : index
      %c0_26 = arith.constant 0 : index
      %29 = vector.load %arg6[%c0_25, %c0_26] : memref<1x64xf32, #tpu.memory_space<vmem>>, vector<1x64xf32>
      tpu.vector_store %arg6[%c0_25, %c0_26], %28 {strides = array<i32>} : memref<1x64xf32, #tpu.memory_space<vmem>>, vector<1x64xf32>,
    } else {
    }
    return
  }
  func.func @transform_0(%arg0: i32, %arg1: i32) -> (i32, i32) {
    %c0_i32 = arith.constant 0 : i32
    return %arg0, %arg1 : i32, i32
  }
  func.func @transform_1(%arg0: i32, %arg1: i32) -> (i32, i32) {
    %c0_i32 = arith.constant 0 : i32
    %c0_i32_0 = arith.constant 0 : i32
    return %c0_i32, %arg1 : i32, i32
  }
  func.func @transform_2(%arg0: i32, %arg1: i32) -> (i32, i32) {
    %c0_i32 = arith.constant 0 : i32
    %c0_i32_0 = arith.constant 0 : i32
    return %arg0, %c0_i32 : i32, i32
  }
  func.func @transform_3(%arg0: i32, %arg1: i32) -> (i32, i32) {
    %c0_i32 = arith.constant 0 : i32
    %c0_i32_0 = arith.constant 0 : i32
    %c0_i32_1 = arith.constant 0 : i32
    return %c0_i32, %c0_i32_0 : i32, i32
  }
  func.func @transform_4(%arg0: i32, %arg1: i32) -> (i32, i32) {
    %c0_i32 = arith.constant 0 : i32
    %c0_i32_0 = arith.constant 0 : i32
    %c0_i32_1 = arith.constant 0 : i32
    return %c0_i32, %c0_i32_0 : i32, i32
  }
}

</mosaic_0001>

<bundles_post_ra>
// kernel: tpu_custom_call.1
= control target key start
LH: loop header
LB: loop body
LE: loop exit
PB: predicated region body
PF: predicated region fallthrough
CT: control target
= control target key end

     0   :  { %10 = vsyncpa [#allocation4], 0  ;;  %vm40_vm0 = vcmask 261120   ;;  %vm20_vm1 = vcmask 523264   ;;  %v338_v2 = vmov 0.0|0.0   ;;  %v339_v5 = vmov 0.0   ;;  %s464_s0 = inlined_call_operand.vmem [shape: f32[8,32], index: 0, kind: input, shape index: {}]   ;;  %s465_s1 = inlined_call_operand.vmem [shape: f32[64,32], index: 1, kind: input, shape index: {}]   ;;  %s466_s2 = inlined_call_operand.hbm [shape: f32[8,64], index: 2, kind: output, shape index: {0}]   ;;  %s467_s3 = inlined_call_operand.hbm [shape: f32[1,64], index: 3, kind: output, shape index: {1}]   ;;  %s468_s4 = inlined_call_operand.hbm [shape: f32[1,64], index: 4, kind: output, shape index: {2}]  }
   0x1   :  { %v32_v0 = vld [vmem:[%s465_s1] sm:$0xff]  ;;  %v33_v1 = vld [vmem:[%s465_s1 + $0x8] sm:$0xff]  ;;  %246 = vmatprep.subr.bf16.mxu0 %v338_v2  ;;  %vm377_vm2 = vmpackc.low %vm40_vm0, %vm40_vm0  ;;  %21 = vst.msk [vmem:[#allocation2] sm:$0xff] %vm20_vm1, %v339_v5  ;;  %vm340_vm3 = vmmov 0  }
   0x2   :  { %v247_v3 = vpack.c.bf16 %v33_v1, %v32_v0  ;;  %243 = vmatprep.mubr.msk.f32.mxu0 %vm340_vm3, %v339_v5 }
   0x4   :  { %249 = vmatpush3.bf16.xpose.msk.msra.mxu0 %vm377_vm2, %v247_v3 }
   0x5   :  { %11 = vsyncpa [#allocation6], 0  ;;  %250 = vmatprep.subr.bf16.mxu0 %v338_v2  ;;  %v34_v6 = vld [vmem:[%s465_s1 + $0x10] sm:$0xff]  ;;  %v35_v7 = vld [vmem:[%s465_s1 + $0x18] sm:$0xff]  ;;  %vm27_vm4 = vcmask 516096  }
   0x6   :  { %v251_v8 = vpack.c.bf16 %v35_v7, %v34_v6  ;;  %v36_v9 = vld [vmem:[%s465_s1 + $0x20] sm:$0xff]  ;;  %v37_v10 = vld [vmem:[%s465_s1 + $0x28] sm:$0xff]  ;;  %v38_v12 = vld [vmem:[%s465_s1 + $0x30] sm:$0xff]  ;;  %28 = vst.msk [vmem:[#allocation5] sm:$0x1] %vm27_vm4, %v339_v5 }
   0x7   :  { %v255_v11 = vpack.c.bf16 %v37_v10, %v36_v9  ;;  %v39_v13 = vld [vmem:[%s465_s1 + $0x38] sm:$0xff]  ;;  %v31_v15 = vld [vmem:[%s464_s0] sm:$0xff]  ;;  %29 = vst.msk [vmem:[#allocation7] sm:$0x1] %vm27_vm4, %v339_v5  ;;  %s341_s1 = smov [#allocation3]  }
   0x8   :  { %v259_v14 = vpack.c.bf16 %v39_v13, %v38_v12  ;;  %v30_v16 = vld [vmem:[#allocation2] sm:$0xff]  ;;  %s174_s7 = sshll.u32 %s341_s1, 4  ;;  %s175_s7 = int_to_ptr.vmem [resolvable:$true] %s174_s7 }
   0x9   :  { %s268_s0 = scalar_lea.vmem %s175_s7, 128  ;;  %p273_p1 = scmp.lt.s32.totalorder %s175_s7, %s175_s7 }
   0xa   :  { %p269_p0 = scmp.ne.s32.totalorder %s175_s7, %s268_s0  ;;  %p274_p2 = scmp.lt.s32.totalorder %s268_s0, %s268_s0 }
   0xc   :  { %253 = vmatpush3.bf16.xpose.msk.msra.mxu0 %vm377_vm2, %v251_v8  ;;  %p275_p3 = por %p274_p2, %p273_p1 }
   0xd   :  { %254 = vmatprep.subr.bf16.mxu0 %v338_v2 }
   0xe   :  { %p276_p4 = pnand %p275_p3, %p269_p0 }
  0x14   :  { %257 = vmatpush3.bf16.xpose.msk.msra.mxu0 %vm377_vm2, %v255_v11 }
  0x15   :  { %258 = vmatprep.subr.bf16.mxu0 %v338_v2 }
  0x1c   :  { %261 = vmatpush3.bf16.xpose.msk.msra.mxu0 %vm377_vm2, %v259_v14 }
  0x23   :  { %244 = vmatmul.mubr.msk.f32.vlgmr.msra.gmra.mrb[0].mxu0 %vm40_vm0, %v31_v15 }
  0xf6   :  { %v134_v17 = vpop.f32.mrb[0].mxu0 }
  0xf7   :  { %v138_v18 = vadd.f32 %v134_v17, %v30_v16  ;;  %v245_v19 = vpop.f32.mrb[1].mxu0 }
  0xf9   :  { %140 = vst.msk [vmem:[#allocation2] sm:$0xff] %vm20_vm1, %v138_v18 }
 0x100   :  { %v144_v20 = vld [vmem:[#allocation2] sm:$0xff] }
 0x101   :  { %v147_v21 = vsel %vm20_vm1, %v144_v20, 0.0  ;;  %145 = vst.msk [vmem:[#allocation3] sm:$0xff] %vm20_vm1, %v144_v20  ;;  %v158_v22 = vmul.f32 %v144_v20, %v144_v20 }
 0x102   :  { %v148_v23 = vrot.slane %v147_v21, 4 }
 0x103   :  { %279 = shalt.err (!%p276_p4)
}
 0x104   :  { %s280_s10 = scalar_lea.hbm %s466_s2, 128 }
 0x105   :  { %p281_p5 = scmp.ne.s32.totalorder %s466_s2, %s280_s10  ;;  %p284_p6 = scmp.lt.u32.totalorder %s280_s10, %s466_s2 }
 0x107   :  { %p286_p7 = pnand %p284_p6, %p281_p5 }
 0x109   :  { %289 = shalt.err (!%p286_p7)
}
 0x10a   :  { %177 = dma.vmem_to_hbm [thread:$0]  %s175_s7, 128, %s466_s2, [#allocation4]   ;;  %v159_v24 = vsel %vm20_vm1, %v158_v22, 0.0  ;;  %v149_v25 = vadd.f32 %v148_v23, %v147_v21  ;;  %v146_v33 = vld [vmem:[#allocation5] sm:$0x1] }
 0x10b   :  { %v160_v26 = vrot.slane %v159_v24, 4  ;;  %s342_s17 = smov [#allocation5]   ;;  %v157_v36 = vld [vmem:[#allocation7] sm:$0x1]  ;;  %s343_s19 = smov [#allocation7]  }
 0x10c   :  { %v150_v27 = vrot.slane %v149_v25, 2  ;;  %s184_s18 = sshll.u32 %s342_s17, 4  ;;  %s194_s20 = sshll.u32 %s343_s19, 4  ;;  %s185_s18 = int_to_ptr.vmem [resolvable:$true] %s184_s18  ;;  %s431_s20 = int_to_ptr.vmem [resolvable:$true] %s194_s20 }
 0x10d   :  { %v161_v28 = vadd.f32 %v160_v26, %v159_v24  ;;  %s290_s2 = scalar_lea.vmem %s185_s18, 16  ;;  %s294_s21 = scalar_lea.vmem %s185_s18, 32 }
 0x10e   :  { %v151_v29 = vadd.f32 %v150_v27, %v149_v25  ;;  %p291_p8 = scmp.ne.s32.totalorder %s185_s18, %s290_s2  ;;  %p295_p9 = scmp.lt.s32.totalorder %s185_s18, %s185_s18 }
 0x10f   :  { %v162_v30 = vrot.slane %v161_v28, 2  ;;  %p296_p10 = scmp.lt.s32.totalorder %s294_s21, %s290_s2 }
 0x110   :  { %v152_v31 = vrot.slane %v151_v29, 1 }
 0x111   :  { %v163_v32 = vadd.f32 %v162_v30, %v161_v28  ;;  %p297_p11 = por %p296_p10, %p295_p9 }
 0x112   :  { %v153_v34 = vadd.f32 %v152_v31, %v151_v29 }
 0x113   :  { %v164_v35 = vrot.slane %v163_v32, 1  ;;  %p298_p12 = pnand %p297_p11, %p291_p8 }
 0x114   :  { %v154_v37 = vadd.f32 %v153_v34, %v146_v33 }
 0x115   :  { %v165_v38 = vadd.f32 %v164_v35, %v163_v32 }
 0x116   :  { %156 = vst.msk [vmem:[#allocation5] sm:$0x1] %vm27_vm4, %v154_v37 }
 0x117   :  { %v166_v39 = vadd.f32 %v165_v38, %v157_v36 }
 0x118   :  { %301 = shalt.err (!%p298_p12)
}
 0x119   :  { %s302_s24 = scalar_lea.hbm %s467_s3, 16 }
 0x11a   :  { %p303_p13 = scmp.ne.s32.totalorder %s467_s3, %s302_s24  ;;  %p306_p0 = scmp.lt.u32.totalorder %s302_s24, %s467_s3 }
 0x11c   :  { %p308_p1 = pnand %p306_p0, %p303_p13 }
 0x11e   :  { %311 = shalt.err (!%p308_p1)
}
 0x11f   :  { %187 = dma.vmem_to_hbm [thread:$0]  %s185_s18, 16, %s467_s3, [#allocation6]   ;;  %167 = vst.msk [vmem:[#allocation7] sm:$0x1] %vm27_vm4, %v166_v39 }
 0x120   :  { %s312_s5 = scalar_lea.vmem %s431_s20, 16  ;;  %s316_s6 = scalar_lea.vmem %s431_s20, 32 }
 0x121   :  { %p313_p2 = scmp.ne.s32.totalorder %s431_s20, %s312_s5  ;;  %p317_p3 = scmp.lt.s32.totalorder %s431_s20, %s431_s20 }
 0x122   :  { %p318_p4 = scmp.lt.s32.totalorder %s316_s6, %s312_s5 }
 0x124   :  { %p319_p5 = por %p318_p4, %p317_p3 }
 0x126   :  { %p320_p6 = pnand %p319_p5, %p313_p2 }
 0x128   :  { %323 = shalt.err (!%p320_p6)
}
 0x129   :  { %s324_s0 = scalar_lea.hbm %s468_s4, 16 }
 0x12a   :  { %p325_p7 = scmp.ne.s32.totalorder %s468_s4, %s324_s0  ;;  %p328_p8 = scmp.lt.u32.totalorder %s324_s0, %s468_s4 }
 0x12c   :  { %p330_p9 = pnand %p328_p8, %p325_p7 }
 0x12e   :  { %333 = shalt.err (!%p330_p9)
}
 0x12f   :  { %197 = dma.vmem_to_hbm [thread:$0]  %s431_s20, 16, %s468_s4, [#allocation6]  }
 0x130   :  { %334 = dma.done.wait [#allocation4], 128  }
 0x131   :  { %335 = vsyncadd [#allocation4], 4294967168 }
 0x132   :  { %336 = dma.done.wait [#allocation6], 32  }
 0x133   :  { %337 = vsyncadd [#allocation6], 4294967264 }
 0x134   :  { %207 = vsyncpa [#allocation4], 1 }
 0x135   :  { %208 = vsyncpa [#allocation6], 1 }

</bundles_post_ra>
